<compile_context>
chip_gen: v7x
topology: tpu7x:2x2x1
jax: 0.10.0
libtpu: 0.0.40
codegen_flags: <defaults>
</compile_context>

<pallas_src>
import math

import jax
import jax.numpy as jnp
import numpy as np
from jax import lax
from jax.experimental import pallas as pl
from jax.experimental.pallas import tpu as pltpu

_INV_SQRT_2PI = 1.0 / math.sqrt(2.0 * math.pi)
_INV_SQRT_2 = 1.0 / math.sqrt(2.0)
_INV_SQRT_PI = 1.0 / math.sqrt(math.pi)
_SQRT_2_OVER_PI = math.sqrt(2.0 / math.pi)


def _cdiv(a, b):
    return -(-a // b)


def _round_up(x, m):
    return ((x + m - 1) // m) * m


def _continuous_sparsemax_kernel(row_ref, basis_ref, out_ref):
    """One (batch_tile x basis_tile) block of r[b, j] = E_{p_theta[b]}[psi_j]."""
    row = row_ref[...]                        # [TB, 4] f32 (precomputed per-row params)
    mu = row[:, 0:1]                          # [TB, 1]
    a_sup = row[:, 1:2]                       # support half-width a
    a_sq = row[:, 2:3]                        # a^2
    inv_2sig = row[:, 3:4]                    # 1 / (2 sigma^2)

    basis = basis_ref[...]                    # [8, TN] f32 (precomputed per-basis params)
    bm = basis[0:1, :]                        # m_j
    inv_bs_s2 = basis[1:2, :]                 # 1 / (s_j * sqrt(2))
    neg_inv_bs_s2 = basis[2:3, :]             # -1 / (s_j * sqrt(2))
    bs_sq = basis[3:4, :]                     # s_j^2
    bs_sq_c = basis[4:5, :]                   # s_j^2 / sqrt(pi)
    bs_c = basis[5:6, :]                      # s_j * sqrt(2/pi)

    # Shifted coordinate d = m_j - mu; endpoints in w = z/sqrt(2) units so erf(w)
    # and exp(-w^2) need no per-element constant multiplies.
    d = bm - mu                               # [TB, TN]
    w_hi = (a_sup - d) * inv_bs_s2            # (hi - m_j) / (s_j sqrt(2))
    w_lo = (a_sup + d) * neg_inv_bs_s2        # (lo - m_j) / (s_j sqrt(2))

    e_hi = jnp.exp(-(w_hi * w_hi))            # sqrt(2 pi) * standardized pdf at hi
    e_lo = jnp.exp(-(w_lo * w_lo))
    i0 = 0.5 * (lax.erf(w_hi) - lax.erf(w_lo))    # \int psi_j over the support

    # r = 1/(2 sigma^2) * [ (a^2 - s_j^2 - d^2) * I0
    #                       + (s_j^2 / sqrt(pi)) * (w_hi e_hi - w_lo e_lo)
    #                       + s_j sqrt(2/pi) * d * (e_hi - e_lo) ]
    term = ((a_sq - bs_sq - d * d) * i0
            + bs_sq_c * (w_hi * e_hi - w_lo * e_lo)
            + bs_c * d * (e_hi - e_lo))
    out_ref[...] = (inv_2sig * term).astype(out_ref.dtype)


def continuous_sparsemax(theta, basis_mu, basis_sigma, *,
                         batch_tile=512, basis_tile=1024):
    """r[b, j] = E_{p_theta[b]}[psi_j]  (forward of ContinuousSparsemax)."""
    B = theta.shape[0]
    N = basis_mu.shape[0]
    out_dtype = theta.dtype

    # ---- per-row precompute (lane-dense, done ONCE, not per basis tile) ----
    th = theta.astype(jnp.float32)
    sigma_sq = -0.5 / th[:, 1]                 # requires theta[:,1] < 0
    mu = th[:, 0] * sigma_sq
    a_sup = jnp.cbrt(1.5 * sigma_sq)
    a_sq = a_sup * a_sup
    inv_2sig = -th[:, 1]                       # 1 / (2 sigma^2)
    row = jnp.stack([mu, a_sup, a_sq, inv_2sig], axis=1)            # [B, 4]

    # ---- per-basis precompute (constant folding), merged into one [8, N] ----
    bm = basis_mu.astype(jnp.float32)
    bs = basis_sigma.astype(jnp.float32)
    inv_bs_s2 = _INV_SQRT_2 / bs
    bs_sq = bs * bs
    zeros = jnp.zeros_like(bm)
    basis = jnp.stack([bm, inv_bs_s2, -inv_bs_s2, bs_sq,
                       bs_sq * _INV_SQRT_PI, bs * _SQRT_2_OVER_PI,
                       zeros, zeros], axis=0)                        # [8, N]

    # ---- adaptive tiling: bound padding waste; lane-dense (multiple-of-128) N ----
    n128 = _round_up(N, 128)
    kb = _cdiv(B, batch_tile)
    kn = _cdiv(n128, basis_tile)
    if kb * kn == 1:
        # v7x has 2 TensorCores sharing 'parallel' grid axes: guarantee >= 2 blocks.
        if n128 >= 256:
            kn = 2
        elif B > 8:
            kb = 2
    tb = _round_up(_cdiv(B, kb), 8)
    tn = _round_up(_cdiv(n128, kn), 128)
    nb = _cdiv(B, tb)
    nn = _cdiv(n128, tn)
    b_pad = nb * tb
    n_pad = nn * tn

    # Pad batch with benign rows (mu=0, a=1, a^2=1, 1/(2 sigma^2)=0.5) — sliced off.
    if b_pad != B:
        pad_row = jnp.array([[0.0, 1.0, 1.0, 0.5]], dtype=jnp.float32)
        row = jnp.concatenate([row, jnp.tile(pad_row, (b_pad - B, 1))], axis=0)
    # Pad basis lanes with zeros (zero inverse scale -> finite zero output) — sliced off.
    if n_pad != N:
        basis = jnp.pad(basis, ((0, 0), (0, n_pad - N)))

    r = pl.pallas_call(
        _continuous_sparsemax_kernel,
        out_shape=jax.ShapeDtypeStruct((b_pad, n_pad), out_dtype),
        grid=(nb, nn),
        in_specs=[
            pl.BlockSpec((tb, 4), lambda i, j: (i, 0)),
            pl.BlockSpec((8, tn), lambda i, j: (0, j)),
        ],
        out_specs=pl.BlockSpec((tb, tn), lambda i, j: (i, j)),
        compiler_params=pltpu.CompilerParams(
            dimension_semantics=("parallel", "parallel")),
    )(row, basis)

    return r[:B, :N]


def _reference(theta, basis_mu, basis_sigma):
    """Pure-JAX reference (original expanded closed form) for validation."""
    theta = theta.astype(jnp.float32)
    sigma_sq = -0.5 / theta[:, 1:2]
    mu = theta[:, 0:1] * sigma_sq
    a_sup = (1.5 * sigma_sq) ** (1.0 / 3.0)
    lo, hi = mu - a_sup, mu + a_sup
    bm = basis_mu[None, :].astype(jnp.float32)
    bs = basis_sigma[None, :].astype(jnp.float32)
    z_hi = (hi - bm) / bs
    z_lo = (lo - bm) / bs
    pdf = lambda z: _INV_SQRT_2PI * jnp.exp(-0.5 * z * z)
    cdf_diff = 0.5 * (jax.scipy.special.erf(z_hi * _INV_SQRT_2)
                      - jax.scipy.special.erf(z_lo * _INV_SQRT_2))
    int_psi = cdf_diff
    int_t = bm * cdf_diff - bs * (pdf(z_hi) - pdf(z_lo))
    int_t2 = (bm * bm + bs * bs) * cdf_diff - bs * (
        (hi + bm) * pdf(z_hi) - (lo + bm) * pdf(z_lo)
    )
    return ((a_sup ** 2 - mu ** 2) * int_psi
            + 2.0 * mu * int_t - int_t2) / (2.0 * sigma_sq)


if __name__ == "__main__":
    key = jax.random.PRNGKey(0)
    k_mu, k_sig = jax.random.split(key)

    B = 12  # not a multiple of 8 -> exercises batch padding

    # Valid canonical parameters (theta[:, 1] must be negative):
    mu_true = jax.random.uniform(k_mu, (B,), minval=0.2, maxval=0.8)
    sig_sq_true = jax.random.uniform(k_sig, (B,), minval=0.01, maxval=0.06)
    theta = jnp.stack(
        [mu_true / sig_sq_true, -0.5 / sig_sq_true], axis=1
    ).astype(jnp.float32)  # [B, 2]

    # psi: two groups of Gaussian basis functions, concatenated along the basis
    # axis exactly as the PyTorch _attention loop does (N = 160, exercises lane padding).
    psi_groups = [
        (jnp.linspace(0.0, 1.0, 64, dtype=jnp.float32),
         jnp.full((64,), 0.03, dtype=jnp.float32)),
        (jnp.linspace(0.0, 1.0, 96, dtype=jnp.float32),
         jnp.full((96,), 0.10, dtype=jnp.float32)),
    ]
    basis_mu = jnp.concatenate([g[0] for g in psi_groups])     # [160]
    basis_sigma = jnp.concatenate([g[1] for g in psi_groups])  # [160]

    r_ref = _reference(theta, basis_mu, basis_sigma)

    # Default tiles: forces the v7x-friendly 1x2 grid split on this small shape.
    r = jax.block_until_ready(continuous_sparsemax(theta, basis_mu, basis_sigma))
    np.testing.assert_allclose(np.asarray(r), np.asarray(r_ref),
                               rtol=1e-4, atol=1e-5)

    # Small explicit tiles: exercises a genuine 2x2 multi-block grid + index maps.
    r2 = jax.block_until_ready(
        continuous_sparsemax(theta, basis_mu, basis_sigma,
                             batch_tile=8, basis_tile=128))
    np.testing.assert_allclose(np.asarray(r2), np.asarray(r_ref),
                               rtol=1e-4, atol=1e-5)

    print("KERNEL_OK")
</pallas_src>

<mosaic_0001>
module attributes {stable_mosaic.version = 11 : i64} {
  func.func @_continuous_sparsemax_kernel(%arg0: i32, %arg1: i32, %arg2: memref<16x4xf32, #tpu.memory_space<vmem>>, %arg3: memref<8x128xf32, #tpu.memory_space<vmem>>, %arg4: memref<16x128xf32, #tpu.memory_space<vmem>>) attributes {dimension_semantics = [#tpu.dimension_semantics<parallel>, #tpu.dimension_semantics<parallel>], iteration_bounds = array<i64: 1, 2>, scalar_prefetch = 0 : i64, scratch_operands = 0 : i64, tpu.core_type = #tpu.core_type<tc>, window_params = [{transform_indices = @transform_0, window_bounds = array<i64: 16, 4>}, {transform_indices = @transform_1, window_bounds = array<i64: 8, 128>}, {transform_indices = @transform_2, window_bounds = array<i64: 16, 128>}]} {
    %c0 = arith.constant 0 : index
    %c0_0 = arith.constant 0 : index
    %0 = vector.load %arg2[%c0, %c0_0] : memref<16x4xf32, #tpu.memory_space<vmem>>, vector<16x4xf32>
    %1 = vector.extract_strided_slice %0 {offsets = [0, 0], sizes = [16, 1], strides = [1, 1]} : vector<16x4xf32> to vector<16x1xf32>
    %2 = vector.extract_strided_slice %0 {offsets = [0, 1], sizes = [16, 1], strides = [1, 1]} : vector<16x4xf32> to vector<16x1xf32>
    %3 = vector.extract_strided_slice %0 {offsets = [0, 2], sizes = [16, 1], strides = [1, 1]} : vector<16x4xf32> to vector<16x1xf32>
    %4 = vector.extract_strided_slice %0 {offsets = [0, 3], sizes = [16, 1], strides = [1, 1]} : vector<16x4xf32> to vector<16x1xf32>
    %c0_1 = arith.constant 0 : index
    %c0_2 = arith.constant 0 : index
    %5 = vector.load %arg3[%c0_1, %c0_2] : memref<8x128xf32, #tpu.memory_space<vmem>>, vector<8x128xf32>
    %6 = vector.extract_strided_slice %5 {offsets = [0, 0], sizes = [1, 128], strides = [1, 1]} : vector<8x128xf32> to vector<1x128xf32>
    %7 = vector.extract_strided_slice %5 {offsets = [1, 0], sizes = [1, 128], strides = [1, 1]} : vector<8x128xf32> to vector<1x128xf32>
    %8 = vector.extract_strided_slice %5 {offsets = [2, 0], sizes = [1, 128], strides = [1, 1]} : vector<8x128xf32> to vector<1x128xf32>
    %9 = vector.extract_strided_slice %5 {offsets = [3, 0], sizes = [1, 128], strides = [1, 1]} : vector<8x128xf32> to vector<1x128xf32>
    %10 = vector.extract_strided_slice %5 {offsets = [4, 0], sizes = [1, 128], strides = [1, 1]} : vector<8x128xf32> to vector<1x128xf32>
    %11 = vector.extract_strided_slice %5 {offsets = [5, 0], sizes = [1, 128], strides = [1, 1]} : vector<8x128xf32> to vector<1x128xf32>
    %12 = vector.broadcast %6 : vector<1x128xf32> to vector<16x128xf32>
    %13 = vector.broadcast %1 : vector<16x1xf32> to vector<16x128xf32>
    %14 = arith.subf %12, %13 : vector<16x128xf32>
    %15 = vector.broadcast %2 : vector<16x1xf32> to vector<16x128xf32>
    %16 = arith.subf %15, %14 : vector<16x128xf32>
    %17 = vector.broadcast %7 : vector<1x128xf32> to vector<16x128xf32>
    %18 = arith.mulf %16, %17 : vector<16x128xf32>
    %19 = vector.broadcast %2 : vector<16x1xf32> to vector<16x128xf32>
    %20 = arith.addf %19, %14 : vector<16x128xf32>
    %21 = vector.broadcast %8 : vector<1x128xf32> to vector<16x128xf32>
    %22 = arith.mulf %20, %21 : vector<16x128xf32>
    %23 = arith.mulf %18, %18 : vector<16x128xf32>
    %cst = arith.constant 0.000000e+00 : f32
    %24 = vector.broadcast %cst : f32 to vector<16x128xf32>
    %25 = arith.subf %24, %23 : vector<16x128xf32>
    %26 = math.exp %25 : vector<16x128xf32>
    %27 = arith.mulf %22, %22 : vector<16x128xf32>
    %cst_3 = arith.constant 0.000000e+00 : f32
    %28 = vector.broadcast %cst_3 : f32 to vector<16x128xf32>
    %29 = arith.subf %28, %27 : vector<16x128xf32>
    %30 = math.exp %29 : vector<16x128xf32>
    %31 = math.erf %18 : vector<16x128xf32>
    %32 = math.erf %22 : vector<16x128xf32>
    %33 = arith.subf %31, %32 : vector<16x128xf32>
    %cst_4 = arith.constant 5.000000e-01 : f32
    %34 = vector.broadcast %cst_4 : f32 to vector<16x128xf32>
    %35 = arith.mulf %34, %33 : vector<16x128xf32>
    %36 = vector.broadcast %3 : vector<16x1xf32> to vector<16x128xf32>
    %37 = vector.broadcast %9 : vector<1x128xf32> to vector<16x128xf32>
    %38 = arith.subf %36, %37 : vector<16x128xf32>
    %39 = arith.mulf %14, %14 : vector<16x128xf32>
    %40 = arith.subf %38, %39 : vector<16x128xf32>
    %41 = arith.mulf %40, %35 : vector<16x128xf32>
    %42 = arith.mulf %18, %26 : vector<16x128xf32>
    %43 = arith.mulf %22, %30 : vector<16x128xf32>
    %44 = arith.subf %42, %43 : vector<16x128xf32>
    %45 = vector.broadcast %10 : vector<1x128xf32> to vector<16x128xf32>
    %46 = arith.mulf %45, %44 : vector<16x128xf32>
    %47 = arith.addf %41, %46 : vector<16x128xf32>
    %48 = vector.broadcast %11 : vector<1x128xf32> to vector<16x128xf32>
    %49 = arith.mulf %48, %14 : vector<16x128xf32>
    %50 = arith.subf %26, %30 : vector<16x128xf32>
    %51 = arith.mulf %49, %50 : vector<16x128xf32>
    %52 = arith.addf %47, %51 : vector<16x128xf32>
    %53 = vector.broadcast %4 : vector<16x1xf32> to vector<16x128xf32>
    %54 = arith.mulf %53, %52 : vector<16x128xf32>
    %c0_5 = arith.constant 0 : index
    %c0_6 = arith.constant 0 : index
    %55 = vector.load %arg4[%c0_5, %c0_6] : memref<16x128xf32, #tpu.memory_space<vmem>>, vector<16x128xf32>
    tpu.vector_store %arg4[%c0_5, %c0_6], %54 {strides = array<i32>} : memref<16x128xf32, #tpu.memory_space<vmem>>, vector<16x128xf32>,
    return
  }
  func.func @transform_0(%arg0: i32, %arg1: i32) -> (i32, i32) {
    %c0_i32 = arith.constant 0 : i32
    %c0_i32_0 = arith.constant 0 : i32
    return %arg0, %c0_i32 : i32, i32
  }
  func.func @transform_1(%arg0: i32, %arg1: i32) -> (i32, i32) {
    %c0_i32 = arith.constant 0 : i32
    %c0_i32_0 = arith.constant 0 : i32
    return %c0_i32, %arg1 : i32, i32
  }
  func.func @transform_2(%arg0: i32, %arg1: i32) -> (i32, i32) {
    %c0_i32 = arith.constant 0 : i32
    return %arg0, %arg1 : i32, i32
  }
}

</mosaic_0001>

<bundles_post_ra>
// kernel: tpu_custom_call.1
= control target key start
LH: loop header
LB: loop body
LE: loop exit
PB: predicated region body
PF: predicated region fallthrough
CT: control target
= control target key end

     0   :  { %7 = vsyncpa [#allocation3], 0  ;;  %s742_s0 = inlined_call_operand.vmem [shape: f32[16,4], index: 0, kind: input, shape index: {}]   ;;  %s743_s1 = inlined_call_operand.vmem [shape: f32[8,256], index: 1, kind: input, shape index: {}]   ;;  %s744_s2 = inlined_call_operand.hbm [shape: f32[16,256], index: 2, kind: output, shape index: {}]  }
   0x1   :  { %9 = vsyncpa [#allocation3 + $0x1], 0  ;;  %s603_s9 = smov 0   ;;  %s605_s10 = smov 0  }
   0x2   :  { %s607_s11 = smov 0   ;;  %s609_s12 = smov 0  }
   0x3   :  { %s611_s13 = smov 0   ;;  %s613_s14 = smov 0  }
   0x4 LB: > { %s404_s15 = sadd.s32 4294967295, %s578_s14   ;;  %s405_s16 = sadd.s32 4294967294, %s578_s14   ;;  %s578_s14 = sphi %s613_s14, %s15_s14   ;;  %s574_s13 = sphi %s611_s13, %s751_s13   ;;  %s570_s12 = sphi %s609_s12, %s750_s12   ;;  %s566_s11 = sphi %s607_s11, %s749_s11   ;;  %s562_s10 = sphi %s605_s10, %s748_s10   ;;  %s558_s9 = sphi %s603_s9, %s747_s9  }
   0x5   : > { %s24_s17 = sadd.s32 1, %s574_s13  ;;  %s88_s18 = sadd.s32 1, %s566_s11 }
   0x6   : > { %p25_p0 = scmp.ge.s32.totalorder %s24_s17, 2  ;;  %p98_p1 = scmp.ne.s32.totalorder %s566_s11, %s562_s10 }
   0x7   : > { %p99_p2 = scmp.eq.s32.totalorder %s404_s15, 1  ;;  %p104_p3 = scmp.ne.s32.totalorder %s562_s10, %s558_s9 }
   0x8   : > { %s753_s17 = smov (%p25_p0, %s24_s17), 0  ;;  %p105_p5 = scmp.eq.s32.totalorder %s405_s16, 1 }
   0x9   : > { %p643_p4 = por %p99_p2, %p98_p1  ;;  %s84_s20 = ssub.s32 %s574_s13, %s753_s17 }
   0xa   : > { %p409_p6 = scmp.ge.s32.totalorder %s578_s14, 1  ;;  %p86_p7 = scmp.eq.s32.totalorder %s84_s20, 0 }
   0xb   : > { %p650_p8 = por %p105_p5, %p104_p3  ;;  %p139_p9 = scmp.lt.s32.totalorder %s578_s14, 3 }
   0xc   : > { %s656_s22 = scalar_select %p86_p7, %s566_s11, %s88_s18  }
   0xd   : > { %p140_p10 = pnand %p409_p6, %p139_p9 }
   0xe   : > { %v176_v0 = vld [vmem:[%s742_s0] sm:$0xff] (!%p140_p10)  ;;  %v580_v1 = vmov (!%p140_p10), 1   ;;  %v581_v2 = vmov (!%p140_p10), 0   ;;  %v177_v3 = vld [vmem:[%s742_s0 + $0x8] sm:$0xff] (!%p140_p10)  ;;  %v582_v4 = vmov (!%p140_p10), 2   ;;  %v583_v5 = vmov (!%p140_p10), 3  }
   0xf   : > { %143 = sbr.rel (%p140_p10) target bundleno = 200 (0xc8), region = 28  ;;  %479 = vset.pattern.permute.xlu1 (!%p140_p10), %v580_v1  ;;  %478 = vset.pattern.permute.xlu0 (!%p140_p10), %v581_v2  ;;  %p171_p11 = scmp.lt.s32.totalorder (!%p140_p10), %s570_s12, 1  ;;  %v179_v6 = vlaneseq (!%p140_p10) }
  0x10   : > { %196 = vperm.xlu1 (!%p140_p10), %479, %v176_v0   ;;  %185 = vperm.xlu0 (!%p140_p10), %478, %v176_v0   ;;  %s162_s4 = sand.u32 (!%p140_p10), 1, %s562_s10   ;;  %s413_s8 = sshll.u32 (!%p140_p10), %s570_s12, 7 }
  0x11   : > { %v180_v7 = vshrl.u32 (!%p140_p10), %v179_v6, 7  ;;  %s410_s5 = sshll.u32 (!%p140_p10), %s162_s4, 4  ;;  %s692_s18 = scalar_lea.hbm (!%p140_p10), %s744_s2, %s413_s8 }
  0x12   : > { %s164_s6 = scalar_lea.vmem (!%p140_p10), [#allocation2], %s410_s5  ;;  %s696_s20 = scalar_lea.sflag (!%p140_p10), [#allocation3], %s162_s4 }
  0x13   : > { %v181_v8 = vsub.s32 (!%p140_p10), 0, %v180_v7  ;;  %v207_v10 = vsub.s32 (!%p140_p10), 1, %v180_v7  ;;  %v215_v11 = vsub.s32 (!%p140_p10), 2, %v180_v7  ;;  %v253_v40 = vsub.s32 (!%p140_p10), 3, %v180_v7  ;;  %s317_s7 = sshll.u32 (!%p140_p10), %s164_s6, 4  ;;  %s687_s7 = int_to_ptr.vmem [resolvable:$true] %s317_s7 }
  0x14   : > { %200 = vperm.xlu1 (!%p140_p10), %479, %v177_v3   ;;  %190 = vperm.xlu0 (!%p140_p10), %478, %v177_v3   ;;  %v271_v46 = vsub.s32 (!%p140_p10), 4, %v180_v7  ;;  %v279_v47 = vsub.s32 (!%p140_p10), 5, %v180_v7  ;;  %s500_s23 = scalar_lea.vmem (!%p140_p10), %s687_s7, 256 }
  0x15   : > { %p501_p12 = scmp.ne.s32.totalorder (!%p140_p10), %s687_s7, %s500_s23 }
  0x16   : > { %s172_s27 = scalar_select %p171_p11, %s570_s12, 1 }
  0x17   : > { %p502_p13 = pnand %p501_p12, %p643_p4  ;;  %s584_s12 = smov [#allocation2]  }
  0x18   : > { %481 = vset.pattern.permute.xlu1 %v582_v4  ;;  %480 = vset.pattern.permute.xlu0 %v582_v4  ;;  %s411_s28 = sshll.u32 %s172_s27, 3  ;;  %s504_s24 = sshll.u32 %s584_s12, 4  ;;  %s505_s24 = int_to_ptr.vmem [resolvable:$false] %s504_s24 }
  0x19   : > { %248 = vperm.xlu1 %481, %v177_v3   ;;  %244 = vperm.xlu0 %480, %v176_v0   ;;  %s174_s3 = scalar_lea.vmem %s743_s1, %s411_s28  ;;  %p503_p0 = pneg %p502_p13 }
  0x1a   : > { %v178_v9 = vld [vmem:[%s174_s3] sm:$0xff]  ;;  %s506_s25 = scalar_lea.vmem %s505_s24, 512  ;;  %p507_p1 = scmp.lt.s32.totalorder %s687_s7, %s505_s24 }
  0x1b   : > { %v182_v12 = vrot.slane %v178_v9, %v181_v8  ;;  %v208_v16 = vrot.slane %v178_v9, %v207_v10  ;;  %v216_v17 = vrot.slane %v178_v9, %v215_v11  ;;  %v254_v44 = vrot.slane %v178_v9, %v253_v40  ;;  %p508_p2 = scmp.lt.s32.totalorder %s506_s25, %s500_s23 }
  0x1c   : > { %v272_v56 = vrot.slane %v178_v9, %v271_v46  ;;  %v280_v57 = vrot.slane %v178_v9, %v279_v47 }
  0x1d   : > { %482 = vset.pattern.permute.xlu1 %v583_v5  ;;  %483 = vset.pattern.permute.xlu0 %v583_v5  ;;  %p509_p3 = por %p508_p2, %p507_p1 }
  0x1e   : > { %290 = vperm.xlu1 %482, %v176_v0   ;;  %294 = vperm.xlu0 %483, %v177_v3  }
  0x1f   : > { %p510_p5 = pnand %p509_p3, %p503_p0 }
  0x8f   : > { %v197_v13 = vpop.permute.xlu1 %196  ;;  %v186_v14 = vpop.permute.xlu0 %185 }
  0x90   : > { %v669_v15 = vsub.f32 %v182_v12, %v186_v14 }
  0x92   : > { %v203_v18 = vsub.f32 %v197_v13, %v669_v15  ;;  %v211_v19 = vadd.f32 %v197_v13, %v669_v15  ;;  %v257_v60 = vmul.f32 %v669_v15, %v669_v15  ;;  %v281_v5 = vmul.f32 %v280_v57, %v669_v15 }
  0x93   : > { %v191_v20 = vpop.permute.xlu0 %190  ;;  %v201_v24 = vpop.permute.xlu1 %200 }
  0x94   : > { %v209_v21 = vmul.f32 %v208_v16, %v203_v18  ;;  %v217_v22 = vmul.f32 %v216_v17, %v211_v19  ;;  %v673_v23 = vsub.f32 %v182_v12, %v191_v20 }
  0x96   : > { %v219_v25 = vmul.f32 %v209_v21, %v209_v21  ;;  %v227_v26 = vmul.f32 %v217_v22, %v217_v22  ;;  %484 = verf.f32 %v209_v21  ;;  %v204_v27 = vsub.f32 %v201_v24, %v673_v23 }
  0x97   : > { %486 = verf.f32 %v217_v22  ;;  %v212_v28 = vadd.f32 %v201_v24, %v673_v23  ;;  %v258_v4 = vmul.f32 %v673_v23, %v673_v23  ;;  %v282_v15 = vmul.f32 %v280_v57, %v673_v23 }
  0x98   : > { %v221_v29 = vsub.f32 0.0, %v219_v25  ;;  %v229_v30 = vsub.f32 0.0, %v227_v26  ;;  %v210_v31 = vmul.f32 %v208_v16, %v204_v27  ;;  %v245_v45 = vpop.permute.xlu0 %244  ;;  %v249_v52 = vpop.permute.xlu1 %248 }
  0x99   : > { %v218_v32 = vmul.f32 %v216_v17, %v212_v28  ;;  %v255_v53 = vsub.f32 %v245_v45, %v254_v44  ;;  %v256_v62 = vsub.f32 %v249_v52, %v254_v44 }
  0x9a   : > { %v223_v33 = vmul.f32 1.442695, %v221_v29  ;;  %v231_v34 = vmul.f32 1.442695, %v229_v30  ;;  %v220_v35 = vmul.f32 %v210_v31, %v210_v31  ;;  %488 = verf.f32 %v210_v31 }
  0x9b   : > { %v228_v36 = vmul.f32 %v218_v32, %v218_v32  ;;  %490 = verf.f32 %v218_v32  ;;  %v259_v0 = vsub.f32 %v255_v53, %v257_v60  ;;  %v260_v11 = vsub.f32 %v256_v62, %v258_v4 }
  0x9c   : > { %492 = vpow2.f32 %v223_v33  ;;  %v222_v37 = vsub.f32 0.0, %v220_v35 }
  0x9d   : > { %494 = vpow2.f32 %v231_v34  ;;  %v230_v38 = vsub.f32 0.0, %v228_v36  ;;  %v291_v17 = vpop.permute.xlu1 %290  ;;  %v295_v25 = vpop.permute.xlu0 %294 }
  0x9e   : > { %v225_v39 = vmul.f32 1.442695, %v222_v37 }
  0x9f   : > { %v233_v41 = vmul.f32 1.442695, %v230_v38 }
  0xa0   : > { %v485_v42 = vpop.eup %484  ;;  %496 = vpow2.f32 %v225_v39 }
  0xa1   : > { %v487_v43 = vpop.eup %486  ;;  %498 = vpow2.f32 %v233_v41 }
  0xa2   : > { %v239_v49 = vsub.f32 %v485_v42, %v487_v43 }
  0xa4   : > { %v489_v48 = vpop.eup %488  ;;  %v241_v59 = vmul.f32 0.5, %v239_v49 }
  0xa5   : > { %v491_v50 = vpop.eup %490 }
  0xa6   : > { %v493_v51 = vpop.eup %492  ;;  %v240_v58 = vsub.f32 %v489_v48, %v491_v50  ;;  %v261_v8 = vmul.f32 %v259_v0, %v241_v59 }
  0xa7   : > { %v495_v54 = vpop.eup %494  ;;  %v263_v55 = vmul.f32 %v493_v51, %v209_v21 }
  0xa8   : > { %v265_v61 = vmul.f32 %v495_v54, %v217_v22  ;;  %v283_v2 = vsub.f32 %v493_v51, %v495_v54  ;;  %v242_v7 = vmul.f32 0.5, %v240_v58 }
  0xaa   : > { %v497_v63 = vpop.eup %496  ;;  %v267_v1 = vsub.f32 %v263_v55, %v265_v61  ;;  %v285_v13 = vmul.f32 %v283_v2, %v281_v5  ;;  %v262_v18 = vmul.f32 %v260_v11, %v242_v7 }
  0xab   : > { %v499_v3 = vpop.eup %498  ;;  %v264_v6 = vmul.f32 %v497_v63, %v210_v31 }
  0xac   : > { %v273_v9 = vmul.f32 %v272_v56, %v267_v1  ;;  %v266_v10 = vmul.f32 %v499_v3, %v218_v32  ;;  %v284_v16 = vsub.f32 %v497_v63, %v499_v3 }
  0xae   : > { %v275_v12 = vadd.f32 %v273_v9, %v261_v8  ;;  %v268_v14 = vsub.f32 %v264_v6, %v266_v10  ;;  %v286_v24 = vmul.f32 %v284_v16, %v282_v15 }
  0xb0   : > { %v287_v19 = vadd.f32 %v285_v13, %v275_v12  ;;  %v274_v20 = vmul.f32 %v272_v56, %v268_v14 }
  0xb2   : > { %v297_v21 = vmul.f32 %v291_v17, %v287_v19  ;;  %v276_v22 = vadd.f32 %v274_v20, %v262_v18 }
  0xb4   : > { %299 = vst [vmem:[%s164_s6] sm:$0xff] %v297_v21  ;;  %v288_v26 = vadd.f32 %v286_v24, %v276_v22 }
  0xb6   : > { %v298_v23 = vmul.f32 %v295_v25, %v288_v26 }
  0xb8   : > { %300 = vst [vmem:[%s164_s6 + $0x8] sm:$0xff] %v298_v23 }
  0xb9   : > { %513 = shalt.err (!%p510_p5)
}
  0xba   : > { %s514_s26 = scalar_lea.hbm %s692_s18, 256  ;;  %s518_s29 = scalar_lea.hbm %s744_s2, 512 }
  0xbb   : > { %p515_p6 = scmp.ne.s32.totalorder %s692_s18, %s514_s26  ;;  %p519_p10 = scmp.lt.u32.totalorder %s692_s18, %s744_s2 }
  0xbc   : > { %p520_p11 = scmp.lt.u32.totalorder %s518_s29, %s514_s26  ;;  %p522_p13 = scmp.lt.u32.totalorder %s514_s26, %s692_s18 }
  0xbd   : > { %p516_p7 = pnand %p515_p6, %p643_p4 }
  0xbe   : > { %p521_p12 = por %p520_p11, %p519_p10 }
  0xbf   : > { %p517_p9 = pneg %p516_p7 }
  0xc0   : > { %p523_p0 = por %p522_p13, %p521_p12 }
  0xc2   : > { %p524_p1 = pnand %p523_p0, %p517_p9 }
  0xc4   : > { %527 = shalt.err (!%p524_p1)
}
  0xc5   : > { %s585_s4 = smov 128   ;;  %s586_s5 = smov 256  }
  0xc6   : > { %s587_s6 = smov 8  }
  0xc7   : > { %416 = dma.vmem_to_hbm [thread:$0]  (%p643_p4), %s687_s7, 256, %s692_s18, %s696_s20, %s585_s4, %s586_s5, %s587_s6  }
  0xc8 PF: > { %p422_p2 = scmp.ge.s32.totalorder %s578_s14, 2  ;;  %s332_s8 = sand.u32 1, %s558_s9  }
  0xc9   : > { %s333_s15 = scalar_lea.sflag [#allocation3], %s332_s8 }
  0xca   : > { %p419_p3 = pnand %p422_p2, %p650_p8 }
  0xcc   : > { %553 = dma.done.wait (!%p419_p3), %s333_s15, 256  }
  0xcd   : > { %555 = vsyncadd (!%p419_p3), %s333_s15, 4294967040  ;;  %s15_s14 = sadd.s32 1, %s578_s14   ;;  %s747_s9 = smov %s562_s10 }
  0xce   : > { %p12_p5 = scmp.ge.s32.totalorder %s15_s14, 4   ;;  %s748_s10 = smov %s566_s11 }
  0xcf   : > { %s749_s11 = smov %s656_s22  ;;  %s750_s12 = smov %s574_s13 }
  0xd0   : > { %s751_s13 = smov %s753_s17  ;;  %14 = sbr.rel (!%p12_p5) target bundleno = 4 (0x4), region = 66 }
  0xd7   :  { %338 = vsyncpa [#allocation3], 1 }
  0xd8   :  { %340 = vsyncpa [#allocation3 + $0x1], 1 }

</bundles_post_ra>
